<compile_context>
chip_gen: v7x
topology: tpu7x:2x2x1
jax: 0.10.0
libtpu: 0.0.40
codegen_flags: <defaults>
</compile_context>

<pallas_src>
import functools
import math

import numpy as np

import jax
import jax.numpy as jnp
from jax import lax
from jax.experimental import pallas as pl
from jax.experimental.pallas import tpu as pltpu

_MiB = 1024 * 1024


def _round_up(x, m):
    return (x + m - 1) // m * m


def _vmem_capacity_bytes():
    """Physical per-core VMEM; conservative (v7x-sized) fallback if unavailable."""
    try:
        info = pltpu.get_tpu_info()
        for name in ("vmem_capacity_bytes", "vmem_size_bytes", "vmem_bytes"):
            v = getattr(info, name, None)
            if v:
                return int(v)
    except Exception:
        pass
    return 64 * _MiB


def _mlp_block_kernel(x_ref, w_ref, b_ref, g_ref, beta_ref, o_ref, *scratch,
                      use_norm, units_out, matmul_dtype, use_acc):
    # x_ref:   (tn, tk)      f32 or bf16 (cast to matmul_dtype in-kernel)
    # w_ref:   (tk, f_pad)   matmul_dtype (bf16)
    # b_ref/g_ref/beta_ref: (1, f_pad) f32
    # o_ref:   (tn, f_pad)   out dtype; doubles as the accumulator when f32
    # scratch: optional f32 accumulator (only when out dtype != f32)
    acc_ref = scratch[0] if use_acc else o_ref
    k = pl.program_id(1)

    @pl.when(k == 0)
    def _():
        # Bias folded into the accumulator init (saves an epilogue add).
        acc_ref[...] = jnp.broadcast_to(b_ref[...], acc_ref.shape)

    xv = x_ref[...]
    if xv.dtype != matmul_dtype:
        xv = xv.astype(matmul_dtype)
    acc_ref[...] += jnp.dot(xv, w_ref[...], preferred_element_type=jnp.float32)

    @pl.when(k == pl.num_programs(1) - 1)
    def _():
        y = acc_ref[...]
        if use_norm:
            # LayerNorm over the true feature width.  Padded columns are exactly
            # zero (zero weight cols / bias / gamma / beta) so the sums divided
            # by units_out are exact.  One-pass variance; gamma folded into the
            # rsqrt scale (one fewer cross-lane reduction).
            inv_n = 1.0 / float(units_out)
            s = jnp.sum(y, axis=-1, keepdims=True)
            s2 = jnp.sum(y * y, axis=-1, keepdims=True)
            mean = s * inv_n
            var = jnp.maximum(s2 * inv_n - mean * mean, 0.0)
            scale = g_ref[...] * lax.rsqrt(var + 1e-5)
            y = (y - mean) * scale + beta_ref[...]
        # activation = ReLU
        o_ref[...] = jnp.maximum(y, 0.0).astype(o_ref.dtype)


def mlp_block(x, w, b, gamma=None, beta=None, *, batchnorm=True,
              matmul_dtype=jnp.bfloat16, out_dtype=None):
    """x: (N, units_in), w: (units_in, units_out) [PyTorch weight transposed],
    b/gamma/beta: (units_out,)."""
    N, units_in = x.shape
    k_w, units_out = w.shape
    assert k_w == units_in
    out_dtype = np.dtype(out_dtype) if out_dtype is not None else np.dtype(x.dtype)

    if gamma is None:
        gamma = jnp.ones((units_out,), jnp.float32)
    if beta is None:
        beta = jnp.zeros((units_out,), jnp.float32)

    f_pad = _round_up(units_out, 128)
    k_full = _round_up(units_in, 128)
    row_mult = 16  # safe sublane multiple for bf16 and f32 tiles

    # ---- generation-aware tile / VMEM budgeting --------------------------------
    vmem_cap = _vmem_capacity_bytes()
    big_vmem = vmem_cap >= 96 * _MiB              # v5e/v6e (128 MiB) vs v7x (64 MiB)
    usage_budget = 88 * _MiB if big_vmem else 46 * _MiB
    limit_cap = 100 * _MiB if big_vmem else 56 * _MiB

    # Row tile: large enough to hide the streamed-W DMA behind MXU work
    # (arithmetic intensity on W ~ tn FLOP/byte), capped so the "parallel" row
    # axis still has >= 2 tiles for megacore sharding.
    tn_target = 1024 if big_vmem else 512
    tn = min(tn_target, _round_up(N, row_mult))
    if N > row_mult:
        tn = min(tn, max(row_mult, _round_up(-(-N // 2), row_mult)))

    # K tile: keep the whole (padded) bf16 weight VMEM-resident when it fits
    # comfortably (fetched from HBM exactly once); otherwise stream big chunks.
    use_acc = out_dtype != np.dtype(jnp.float32)
    w_itemsize = np.dtype(matmul_dtype).itemsize
    if 2 * k_full * f_pad * w_itemsize <= usage_budget // 2:
        tk = k_full
    else:
        tk = min(2048 if big_vmem else 1024, k_full)

    x_itemsize = np.dtype(x.dtype).itemsize
    out_itemsize = out_dtype.itemsize

    def _usage(tn_, tk_):
        return (2 * tn_ * tk_ * x_itemsize              # x double buffer
                + 2 * tk_ * f_pad * w_itemsize          # W double buffer
                + 2 * tn_ * f_pad * out_itemsize        # out double buffer
                + (tn_ * f_pad * 4 if use_acc else 0)   # f32 accumulator scratch
                + 3 * 8 * f_pad * 4)                    # bias / gamma / beta

    # Shrink tiles until the VMEM estimate fits the per-generation budget.
    while _usage(tn, tk) > usage_budget:
        if tk > 512:
            tk = max(512, (tk // 2) // 128 * 128)
        elif tn > 256:
            tn = max(256, (tn // 2) // row_mult * row_mult)
        elif tk > 128:
            tk = max(128, (tk // 2) // 128 * 128)
        elif tn > row_mult:
            tn = max(row_mult, (tn // 2) // row_mult * row_mult)
        else:
            break

    n_pad = _round_up(N, tn)
    k_pad = _round_up(units_in, tk)

    # ---- inputs: avoid a wrapper-side HBM pass over x when already aligned -----
    if n_pad == N and k_pad == units_in:
        xp = x                                   # kernel casts tiles to bf16
    else:
        xp = jnp.zeros((n_pad, k_pad), matmul_dtype).at[:N, :units_in].set(
            x.astype(matmul_dtype))

    if (k_pad == units_in and f_pad == units_out
            and x.dtype == np.dtype(matmul_dtype) and w.dtype == np.dtype(matmul_dtype)):
        wp = w
    else:
        wp = jnp.zeros((k_pad, f_pad), matmul_dtype).at[:units_in, :units_out].set(
            w.astype(matmul_dtype))

    bp = jnp.zeros((1, f_pad), jnp.float32).at[0, :units_out].set(
        b.astype(jnp.float32))
    gp = jnp.zeros((1, f_pad), jnp.float32).at[0, :units_out].set(
        gamma.astype(jnp.float32))
    betap = jnp.zeros((1, f_pad), jnp.float32).at[0, :units_out].set(
        beta.astype(jnp.float32))

    vmem_limit = int(min(limit_cap, max(32 * _MiB, _usage(tn, tk) + 16 * _MiB)))

    grid = (n_pad // tn, k_pad // tk)
    kernel = functools.partial(_mlp_block_kernel, use_norm=batchnorm,
                               units_out=units_out, matmul_dtype=matmul_dtype,
                               use_acc=use_acc)
    scratch_shapes = [pltpu.VMEM((tn, f_pad), jnp.float32)] if use_acc else []

    out = pl.pallas_call(
        kernel,
        out_shape=jax.ShapeDtypeStruct((n_pad, f_pad), out_dtype),
        grid_spec=pltpu.PrefetchScalarGridSpec(
            num_scalar_prefetch=0,
            grid=grid,
            in_specs=[
                pl.BlockSpec((tn, tk), lambda i, k: (i, k)),
                pl.BlockSpec((tk, f_pad), lambda i, k: (k, 0)),
                pl.BlockSpec((1, f_pad), lambda i, k: (0, 0)),
                pl.BlockSpec((1, f_pad), lambda i, k: (0, 0)),
                pl.BlockSpec((1, f_pad), lambda i, k: (0, 0)),
            ],
            out_specs=pl.BlockSpec((tn, f_pad), lambda i, k: (i, 0)),
            scratch_shapes=scratch_shapes,
        ),
        compiler_params=pltpu.CompilerParams(
            dimension_semantics=("parallel", "arbitrary"),
            vmem_limit_bytes=vmem_limit,
        ),
    )(xp, wp, bp, gp, betap)

    if n_pad != N or f_pad != units_out:
        out = out[:N, :units_out]
    return out


def _reference(x, w, b, gamma, beta, batchnorm, matmul_dtype=jnp.bfloat16):
    # Mirror the kernel's bf16 matmul with f32 accumulation for a fair check.
    y = jnp.dot(x.astype(matmul_dtype), w.astype(matmul_dtype),
                preferred_element_type=jnp.float32) + b
    if batchnorm:
        mean = jnp.mean(y, axis=-1, keepdims=True)
        var = jnp.mean((y - mean) ** 2, axis=-1, keepdims=True)
        y = (y - mean) * lax.rsqrt(var + 1e-5) * gamma + beta
    return jnp.maximum(y, 0.0)


if __name__ == "__main__":
    # Small shapes consistent with an MLP block.
    N, units_in, units_out = 16, 32, 32

    key = jax.random.PRNGKey(0)
    kx, kw, kb = jax.random.split(key, 3)

    x = jax.random.normal(kx, (N, units_in), dtype=jnp.float32)

    # Deterministic parameter init matching PyTorch __init__:
    #   weight: xavier_uniform_ (glorot), bias: U(-1/sqrt(fan_in), 1/sqrt(fan_in))
    limit = math.sqrt(6.0 / (units_in + units_out))
    # PyTorch stores weight as (out, in); keep transposed (in, out) for x @ W.
    w = jax.random.uniform(kw, (units_in, units_out), dtype=jnp.float32,
                           minval=-limit, maxval=limit)
    bias_bound = 1.0 / math.sqrt(units_in)
    b = jax.random.uniform(kb, (units_out,), dtype=jnp.float32,
                           minval=-bias_bound, maxval=bias_bound)
    # LayerNorm params at their PyTorch defaults.
    gamma = jnp.ones((units_out,), jnp.float32)
    beta = jnp.zeros((units_out,), jnp.float32)

    # With LayerNorm, f32 output (accumulates directly into o_ref).
    out = mlp_block(x, w, b, gamma, beta, batchnorm=True)
    out = jax.block_until_ready(out)
    ref = _reference(x, w, b, gamma, beta, batchnorm=True)
    assert out.shape == (N, units_out)
    assert jnp.allclose(out, ref, atol=1e-3, rtol=1e-3), "mismatch vs reference (norm)"

    # Without normalization (batchnorm=False path of the module).
    out2 = mlp_block(x, w, b, batchnorm=False)
    out2 = jax.block_until_ready(out2)
    ref2 = _reference(x, w, b, gamma, beta, batchnorm=False)
    assert jnp.allclose(out2, ref2, atol=1e-3, rtol=1e-3), "mismatch vs reference (no norm)"

    # bf16 output path (exercises the f32 scratch accumulator branch).
    out3 = mlp_block(x, w, b, gamma, beta, batchnorm=True, out_dtype=jnp.bfloat16)
    out3 = jax.block_until_ready(out3)
    assert out3.dtype == jnp.bfloat16
    assert jnp.allclose(out3.astype(jnp.float32), ref, atol=5e-2, rtol=5e-2), \
        "mismatch vs reference (bf16 out)"

    print("KERNEL_OK")
</pallas_src>

<mosaic_0001>
module attributes {stable_mosaic.version = 11 : i64} {
  func.func @_mlp_block_kernel(%arg0: i32, %arg1: i32, %arg2: memref<16x128xbf16, #tpu.memory_space<vmem>>, %arg3: memref<128x128xbf16, #tpu.memory_space<vmem>>, %arg4: memref<1x128xf32, #tpu.memory_space<vmem>>, %arg5: memref<1x128xf32, #tpu.memory_space<vmem>>, %arg6: memref<1x128xf32, #tpu.memory_space<vmem>>, %arg7: memref<16x128xf32, #tpu.memory_space<vmem>>) attributes {dimension_semantics = [#tpu.dimension_semantics<parallel>, #tpu.dimension_semantics<arbitrary>], iteration_bounds = array<i64: 1, 1>, scalar_prefetch = 0 : i64, scratch_operands = 0 : i64, tpu.core_type = #tpu.core_type<tc>, window_params = [{transform_indices = @transform_0, window_bounds = array<i64: 16, 128>}, {transform_indices = @transform_1, window_bounds = array<i64: 128, 128>}, {pipeline_mode = #tpu.pipeline_mode<synchronous>, transform_indices = @transform_2, window_bounds = array<i64: 1, 128>}, {pipeline_mode = #tpu.pipeline_mode<synchronous>, transform_indices = @transform_3, window_bounds = array<i64: 1, 128>}, {pipeline_mode = #tpu.pipeline_mode<synchronous>, transform_indices = @transform_4, window_bounds = array<i64: 1, 128>}, {transform_indices = @transform_5, window_bounds = array<i64: 16, 128>}]} {
    %c0_i32 = arith.constant 0 : i32
    %0 = arith.cmpi eq, %arg1, %c0_i32 : i32
    %1 = arith.extui %0 : i1 to i32
    %c0_i32_0 = arith.constant 0 : i32
    %2 = arith.cmpi ne, %1, %c0_i32_0 : i32
    scf.if %2 {
      %c0_10 = arith.constant 0 : index
      %c0_11 = arith.constant 0 : index
      %12 = vector.load %arg4[%c0_10, %c0_11] : memref<1x128xf32, #tpu.memory_space<vmem>>, vector<1x128xf32>
      %13 = vector.shape_cast %12 : vector<1x128xf32> to vector<1x128xf32>
      %14 = vector.broadcast %13 : vector<1x128xf32> to vector<16x128xf32>
      %c0_12 = arith.constant 0 : index
      %c0_13 = arith.constant 0 : index
      %15 = vector.load %arg7[%c0_12, %c0_13] : memref<16x128xf32, #tpu.memory_space<vmem>>, vector<16x128xf32>
      tpu.vector_store %arg7[%c0_12, %c0_13], %14 {strides = array<i32>} : memref<16x128xf32, #tpu.memory_space<vmem>>, vector<16x128xf32>,
    } else {
    }
    %c0 = arith.constant 0 : index
    %c0_1 = arith.constant 0 : index
    %3 = vector.load %arg2[%c0, %c0_1] : memref<16x128xbf16, #tpu.memory_space<vmem>>, vector<16x128xbf16>
    %c0_2 = arith.constant 0 : index
    %c0_3 = arith.constant 0 : index
    %4 = vector.load %arg7[%c0_2, %c0_3] : memref<16x128xf32, #tpu.memory_space<vmem>>, vector<16x128xf32>
    %c0_4 = arith.constant 0 : index
    %c0_5 = arith.constant 0 : index
    %5 = vector.load %arg3[%c0_4, %c0_5] : memref<128x128xbf16, #tpu.memory_space<vmem>>, vector<128x128xbf16>
    %cst = arith.constant dense<0.000000e+00> : vector<16x128xf32>
    %6 = tpu.matmul %3, %5, %cst {dimension_numbers = #tpu.dot_dimension_numbers<[1], [0], [0], [1], [0, 0, 1, 1], [], []>} : vector<16x128xbf16>, vector<128x128xbf16>, vector<16x128xf32> -> vector<16x128xf32>
    %7 = arith.addf %4, %6 : vector<16x128xf32>
    %c0_6 = arith.constant 0 : index
    %c0_7 = arith.constant 0 : index
    %8 = vector.load %arg7[%c0_6, %c0_7] : memref<16x128xf32, #tpu.memory_space<vmem>>, vector<16x128xf32>
    tpu.vector_store %arg7[%c0_6, %c0_7], %7 {strides = array<i32>} : memref<16x128xf32, #tpu.memory_space<vmem>>, vector<16x128xf32>,
    %c0_i32_8 = arith.constant 0 : i32
    %9 = arith.cmpi eq, %arg1, %c0_i32_8 : i32
    %10 = arith.extui %9 : i1 to i32
    %c0_i32_9 = arith.constant 0 : i32
    %11 = arith.cmpi ne, %10, %c0_i32_9 : i32
    scf.if %11 {
      %c0_10 = arith.constant 0 : index
      %c0_11 = arith.constant 0 : index
      %12 = vector.load %arg7[%c0_10, %c0_11] : memref<16x128xf32, #tpu.memory_space<vmem>>, vector<16x128xf32>
      %cst_12 = arith.constant dense<0.000000e+00> : vector<16xf32>
      %13 = vector.multi_reduction <add>, %12, %cst_12 [1] : vector<16x128xf32> to vector<16xf32>
      %14 = vector.shape_cast %13 : vector<16xf32> to vector<16x1xf32>
      %15 = arith.mulf %12, %12 : vector<16x128xf32>
      %cst_13 = arith.constant dense<0.000000e+00> : vector<16xf32>
      %16 = vector.multi_reduction <add>, %15, %cst_13 [1] : vector<16x128xf32> to vector<16xf32>
      %17 = vector.shape_cast %16 : vector<16xf32> to vector<16x1xf32>
      %cst_14 = arith.constant 3.125000e-02 : f32
      %18 = vector.broadcast %cst_14 : f32 to vector<16x1xf32>
      %19 = arith.mulf %14, %18 : vector<16x1xf32>
      %cst_15 = arith.constant 3.125000e-02 : f32
      %20 = vector.broadcast %cst_15 : f32 to vector<16x1xf32>
      %21 = arith.mulf %17, %20 : vector<16x1xf32>
      %22 = arith.mulf %19, %19 : vector<16x1xf32>
      %23 = arith.subf %21, %22 : vector<16x1xf32>
      %cst_16 = arith.constant 0.000000e+00 : f32
      %24 = vector.broadcast %cst_16 : f32 to vector<16x1xf32>
      %25 = arith.maximumf %23, %24 : vector<16x1xf32>
      %c0_17 = arith.constant 0 : index
      %c0_18 = arith.constant 0 : index
      %26 = vector.load %arg5[%c0_17, %c0_18] : memref<1x128xf32, #tpu.memory_space<vmem>>, vector<1x128xf32>
      %cst_19 = arith.constant 9.99999974E-6 : f32
      %27 = vector.broadcast %cst_19 : f32 to vector<16x1xf32>
      %28 = arith.addf %25, %27 : vector<16x1xf32>
      %29 = math.rsqrt %28 : vector<16x1xf32>
      %30 = vector.broadcast %26 : vector<1x128xf32> to vector<16x128xf32>
      %31 = vector.broadcast %29 : vector<16x1xf32> to vector<16x128xf32>
      %32 = arith.mulf %30, %31 : vector<16x128xf32>
      %33 = vector.broadcast %19 : vector<16x1xf32> to vector<16x128xf32>
      %34 = arith.subf %12, %33 : vector<16x128xf32>
      %35 = arith.mulf %34, %32 : vector<16x128xf32>
      %c0_20 = arith.constant 0 : index
      %c0_21 = arith.constant 0 : index
      %36 = vector.load %arg6[%c0_20, %c0_21] : memref<1x128xf32, #tpu.memory_space<vmem>>, vector<1x128xf32>
      %37 = vector.broadcast %36 : vector<1x128xf32> to vector<16x128xf32>
      %38 = arith.addf %35, %37 : vector<16x128xf32>
      %cst_22 = arith.constant 0.000000e+00 : f32
      %39 = vector.broadcast %cst_22 : f32 to vector<16x128xf32>
      %40 = arith.maximumf %38, %39 : vector<16x128xf32>
      %c0_23 = arith.constant 0 : index
      %c0_24 = arith.constant 0 : index
      %41 = vector.load %arg7[%c0_23, %c0_24] : memref<16x128xf32, #tpu.memory_space<vmem>>, vector<16x128xf32>
      tpu.vector_store %arg7[%c0_23, %c0_24], %40 {strides = array<i32>} : memref<16x128xf32, #tpu.memory_space<vmem>>, vector<16x128xf32>,
    } else {
    }
    return
  }
  func.func @transform_0(%arg0: i32, %arg1: i32) -> (i32, i32) {
    %c0_i32 = arith.constant 0 : i32
    return %arg0, %arg1 : i32, i32
  }
  func.func @transform_1(%arg0: i32, %arg1: i32) -> (i32, i32) {
    %c0_i32 = arith.constant 0 : i32
    %c0_i32_0 = arith.constant 0 : i32
    return %arg1, %c0_i32 : i32, i32
  }
  func.func @transform_2(%arg0: i32, %arg1: i32) -> (i32, i32) {
    %c0_i32 = arith.constant 0 : i32
    %c0_i32_0 = arith.constant 0 : i32
    %c0_i32_1 = arith.constant 0 : i32
    return %c0_i32, %c0_i32_0 : i32, i32
  }
  func.func @transform_3(%arg0: i32, %arg1: i32) -> (i32, i32) {
    %c0_i32 = arith.constant 0 : i32
    %c0_i32_0 = arith.constant 0 : i32
    %c0_i32_1 = arith.constant 0 : i32
    return %c0_i32, %c0_i32_0 : i32, i32
  }
  func.func @transform_4(%arg0: i32, %arg1: i32) -> (i32, i32) {
    %c0_i32 = arith.constant 0 : i32
    %c0_i32_0 = arith.constant 0 : i32
    %c0_i32_1 = arith.constant 0 : i32
    return %c0_i32, %c0_i32_0 : i32, i32
  }
  func.func @transform_5(%arg0: i32, %arg1: i32) -> (i32, i32) {
    %c0_i32 = arith.constant 0 : i32
    %c0_i32_0 = arith.constant 0 : i32
    return %arg0, %c0_i32 : i32, i32
  }
}

</mosaic_0001>

<bundles_post_ra>
// kernel: tpu_custom_call.1
= control target key start
LH: loop header
LB: loop body
LE: loop exit
PB: predicated region body
PF: predicated region fallthrough
CT: control target
= control target key end

     0   :  { %10 = vsyncpa [#allocation3], 0  ;;  %s474_s0 = inlined_call_operand.hbm [shape: bf16[16,128], index: 0, kind: input, shape index: {}]   ;;  %s475_s1 = inlined_call_operand.hbm [shape: bf16[128,128], index: 1, kind: input, shape index: {}]   ;;  %s476_s2 = inlined_call_operand.vmem [shape: f32[1,128], index: 2, kind: input, shape index: {}]   ;;  %s477_s3 = inlined_call_operand.vmem [shape: f32[1,128], index: 3, kind: input, shape index: {}]   ;;  %s478_s4 = inlined_call_operand.vmem [shape: f32[1,128], index: 4, kind: input, shape index: {}]   ;;  %s479_s5 = inlined_call_operand.hbm [shape: f32[16,128], index: 5, kind: output, shape index: {}]  }
   0x1   :  { %11 = vsyncpa [#allocation6], 0 }
   0x2   :  { %12 = vsyncpa [#allocation4], 0  ;;  %s390_s18 = smov [#allocation2]   ;;  %s318_s22 = scalar_lea.hbm %s474_s0, 128 }
   0x3   :  { %s18_s19 = sshll.u32 %s390_s18, 4  ;;  %p319_p0 = scmp.ne.s32.totalorder %s474_s0, %s318_s22  ;;  %s19_s19 = int_to_ptr.vmem [resolvable:$true] %s18_s19 }
   0x4   :  { %p322_p1 = scmp.lt.u32.totalorder %s318_s22, %s474_s0 }
   0x6   :  { %p324_p2 = pnand %p322_p1, %p319_p0 }
   0x8   :  { %327 = shalt.err (!%p324_p2)
}
   0x9   :  { %s328_s27 = scalar_lea.vmem %s19_s19, 128  ;;  %p333_p4 = scmp.lt.s32.totalorder %s19_s19, %s19_s19 }
   0xa   :  { %p329_p3 = scmp.ne.s32.totalorder %s19_s19, %s328_s27  ;;  %p334_p5 = scmp.lt.s32.totalorder %s328_s27, %s328_s27 }
   0xc   :  { %p335_p6 = por %p334_p5, %p333_p4 }
   0xe   :  { %p336_p7 = pnand %p335_p6, %p329_p3 }
  0x10   :  { %339 = shalt.err (!%p336_p7)
}
  0x11   :  { %s391_s28 = smov 64   ;;  %s392_s29 = smov 4  }
  0x12   :  { %24 = dma.hbm_to_vmem [thread:$0]  %s474_s0, 128, %s19_s19, [#allocation3], %s391_s28, %s391_s28, %s392_s29  }
  0x13   :  { %s393_s7 = smov [#allocation5]   ;;  %s340_s11 = scalar_lea.hbm %s475_s1, 1024 }
  0x14   :  { %s30_s8 = sshll.u32 %s393_s7, 4  ;;  %p341_p8 = scmp.ne.s32.totalorder %s475_s1, %s340_s11  ;;  %s31_s8 = int_to_ptr.vmem [resolvable:$true] %s30_s8 }
  0x15   :  { %p344_p9 = scmp.lt.u32.totalorder %s340_s11, %s475_s1 }
  0x17   :  { %p346_p10 = pnand %p344_p9, %p341_p8 }
  0x19   :  { %349 = shalt.err (!%p346_p10)
}
  0x1a   :  { %s350_s16 = scalar_lea.vmem %s31_s8, 1024  ;;  %p355_p12 = scmp.lt.s32.totalorder %s31_s8, %s31_s8 }
  0x1b   :  { %p351_p11 = scmp.ne.s32.totalorder %s31_s8, %s350_s16  ;;  %p356_p13 = scmp.lt.s32.totalorder %s350_s16, %s350_s16 }
  0x1d   :  { %p357_p0 = por %p356_p13, %p355_p12 }
  0x1f   :  { %p358_p1 = pnand %p357_p0, %p351_p11 }
  0x21   :  { %361 = shalt.err (!%p358_p1)
}
  0x22   :  { %36 = dma.hbm_to_vmem [thread:$0]  %s475_s1, 1024, %s31_s8, [#allocation6], %s391_s28, %s391_s28, %s392_s29  }
  0x23   :  { %384 = dma.done.wait [#allocation3], 128  }
  0x24   :  { %385 = vsyncadd [#allocation3], 4294967168 }
  0x25   :  { %386 = dma.done.wait [#allocation6], 1024  }
  0x26   :  { %387 = vsyncadd [#allocation6], 4294966272  ;;  %v394_v0 = vmov 0.0   ;;  %vm395_vm0 = vmmov 0   ;;  %v305_v1 = vld [vmem:[#allocation5] sm:$0xff]   ;;  %v306_v2 = vld [vmem:[#allocation5 + $0x8] sm:$0xff]  }
  0x27   :  { %276 = vmatprep.subr.bf16.mxu0 %v394_v0  ;;  %292 = vmatprep.mubr.msk.bf16.mxu0 %vm395_vm0, %v394_v0  ;;  %v307_v3 = vld [vmem:[#allocation5 + $0x10] sm:$0xff]   ;;  %v308_v4 = vld [vmem:[#allocation5 + $0x18] sm:$0xff]   ;;  %v309_v5 = vld [vmem:[#allocation5 + $0x20] sm:$0xff]   ;;  %s396_s22 = smov [#allocation7]  }
  0x28   :  { %277 = vmatpush3.bf16.msra.mxu0 %v305_v1  ;;  %v310_v6 = vld [vmem:[#allocation5 + $0x28] sm:$0xff]   ;;  %v311_v7 = vld [vmem:[#allocation5 + $0x30] sm:$0xff]   ;;  %v312_v8 = vld [vmem:[#allocation5 + $0x38] sm:$0xff]   ;;  %s242_s23 = sshll.u32 %s396_s22, 4  ;;  %s243_s23 = int_to_ptr.vmem [resolvable:$true] %s242_s23 }
  0x29   :  { %278 = vmatprep.subr.bf16.mxu0 %v394_v0  ;;  %v313_v9 = vld [vmem:[#allocation2] sm:$0xff]   ;;  %p367_p3 = scmp.lt.s32.totalorder %s243_s23, %s243_s23 }
  0x2a   :  { %v255_v10 = vld [vmem:[%s476_s2] ss:$0 sm:$0xff] }
  0x2b   :  { %v265_v35 = vld [vmem:[%s477_s3] ss:$0 sm:$0xff]  ;;  %s362_s3 = scalar_lea.vmem %s243_s23, 256 }
  0x2c   :  { %279 = vmatpush3.bf16.msra.mxu0 %v306_v2  ;;  %v266_v39 = vld [vmem:[%s478_s4] ss:$0 sm:$0xff]  ;;  %p363_p2 = scmp.ne.s32.totalorder %s243_s23, %s362_s3  ;;  %p368_p4 = scmp.lt.s32.totalorder %s362_s3, %s362_s3 }
  0x2d   :  { %280 = vmatprep.subr.bf16.mxu0 %v394_v0 }
  0x2e   :  { %p369_p5 = por %p368_p4, %p367_p3 }
  0x30   :  { %281 = vmatpush3.bf16.msra.mxu0 %v307_v3  ;;  %p370_p6 = pnand %p369_p5, %p363_p2 }
  0x31   :  { %282 = vmatprep.subr.bf16.mxu0 %v394_v0 }
  0x34   :  { %283 = vmatpush3.bf16.msra.mxu0 %v308_v4 }
  0x35   :  { %284 = vmatprep.subr.bf16.mxu0 %v394_v0 }
  0x38   :  { %285 = vmatpush3.bf16.msra.mxu0 %v309_v5 }
  0x39   :  { %286 = vmatprep.subr.bf16.mxu0 %v394_v0 }
  0x3c   :  { %287 = vmatpush3.bf16.msra.mxu0 %v310_v6 }
  0x3d   :  { %288 = vmatprep.subr.bf16.mxu0 %v394_v0 }
  0x40   :  { %289 = vmatpush3.bf16.msra.mxu0 %v311_v7 }
  0x41   :  { %290 = vmatprep.subr.bf16.mxu0 %v394_v0 }
  0x44   :  { %291 = vmatpush3.bf16.msra.mxu0 %v312_v8 }
  0x47   :  { %293 = vmatmul.mubr.bf16.vlgmr.msra.gmra.mrb[0].mxu0 %v313_v9 }
 0x11a   :  { %v171_v11 = vpop.f32.mrb[0].mxu0 }
 0x11b   :  { %v178_v12 = vadd.f32 %v255_v10, %v171_v11  ;;  %v294_v13 = vpop.f32.mrb[1].mxu0 }
 0x11c   :  { %v174_v14 = vpop.f32.mrb[2].mxu0 }
 0x11d   :  { %v179_v15 = vadd.f32 %v255_v10, %v174_v14  ;;  %v295_v16 = vpop.f32.mrb[3].mxu0  ;;  %187 = vadd.xlane.f32.xlu0 %v178_v12  ;;  %v191_v17 = vmul.f32 %v178_v12, %v178_v12 }
 0x11f   :  { %193 = vadd.xlane.f32.xlu1 %v191_v17  ;;  %v192_v18 = vmul.f32 %v179_v15, %v179_v15 }
 0x121   :  { %189 = vadd.xlane.f32.xlu0 %v179_v15 }
 0x123   :  { %195 = vadd.xlane.f32.xlu1 %v192_v18 }
 0x1aa   :  { %v188_v19 = vpop.xlane.xlu0 %187 }
 0x1ab   :  { %v197_v20 = vmul.f32 0.03125, %v188_v19 }
 0x1ac   :  { %v194_v21 = vpop.xlane.xlu1 %193 }
 0x1ad   :  { %v201_v22 = vmul.f32 %v197_v20, %v197_v20  ;;  %v199_v23 = vmul.f32 0.03125, %v194_v21  ;;  %v220_v37 = vsub.f32 %v178_v12, %v197_v20 }
 0x1ae   :  { %v190_v24 = vpop.xlane.xlu0 %189 }
 0x1af   :  { %v203_v25 = vsub.f32 %v199_v23, %v201_v22  ;;  %v198_v26 = vmul.f32 0.03125, %v190_v24 }
 0x1b0   :  { %v196_v27 = vpop.xlane.xlu1 %195 }
 0x1b1   :  { %v205_v28 = vmax.f32 %v203_v25, 0.0  ;;  %v202_v29 = vmul.f32 %v198_v26, %v198_v26  ;;  %v200_v30 = vmul.f32 0.03125, %v196_v27  ;;  %v221_v42 = vsub.f32 %v179_v15, %v198_v26 }
 0x1b3   :  { %v208_v31 = vadd.f32 1e-05, %v205_v28  ;;  %v204_v32 = vsub.f32 %v200_v30, %v202_v29 }
 0x1b5   :  { %314 = vrsqrt.f32 %v208_v31  ;;  %v206_v33 = vmax.f32 %v204_v32, 0.0 }
 0x1b7   :  { %v209_v34 = vadd.f32 1e-05, %v206_v33 }
 0x1b9   :  { %316 = vrsqrt.f32 %v209_v34 }
 0x1bf   :  { %v315_v36 = vpop.eup %314 }
 0x1c0   :  { %v218_v38 = vmul.f32 %v315_v36, %v265_v35 }
 0x1c2   :  { %v222_v40 = vmul.f32 %v220_v37, %v218_v38 }
 0x1c3   :  { %v317_v41 = vpop.eup %316 }
 0x1c4   :  { %v219_v43 = vmul.f32 %v317_v41, %v265_v35  ;;  %v231_v44 = vadd.f32 %v266_v39, %v222_v40 }
 0x1c6   :  { %v223_v45 = vmul.f32 %v221_v42, %v219_v43  ;;  %v233_v46 = vmax.f32 %v231_v44, 0.0 }
 0x1c8   :  { %v232_v47 = vadd.f32 %v266_v39, %v223_v45  ;;  %235 = vst [vmem:[#allocation7] sm:$0xff] %v233_v46 }
 0x1ca   :  { %v234_v48 = vmax.f32 %v232_v47, 0.0 }
 0x1cc   :  { %236 = vst [vmem:[#allocation7 + $0x8] sm:$0xff] %v234_v48 }
 0x1cd   :  { %373 = shalt.err (!%p370_p6)
}
 0x1ce   :  { %s374_s25 = scalar_lea.hbm %s479_s5, 256 }
 0x1cf   :  { %p375_p7 = scmp.ne.s32.totalorder %s479_s5, %s374_s25  ;;  %p378_p8 = scmp.lt.u32.totalorder %s374_s25, %s479_s5 }
 0x1d1   :  { %p380_p9 = pnand %p378_p8, %p375_p7 }
 0x1d3   :  { %383 = shalt.err (!%p380_p9)
}
 0x1d4   :  { %s397_s30 = smov 128   ;;  %s398_s6 = smov 8  }
 0x1d5   :  { %248 = dma.vmem_to_hbm [thread:$0]  %s243_s23, 256, %s479_s5, [#allocation4], %s397_s30, %s397_s30, %s398_s6  }
 0x1d6   :  { %388 = dma.done.wait [#allocation4], 256  }
 0x1d7   :  { %389 = vsyncadd [#allocation4], 4294967040 }
 0x1d8   :  { %252 = vsyncpa [#allocation3], 1 }
 0x1d9   :  { %253 = vsyncpa [#allocation6], 1 }
 0x1da   :  { %254 = vsyncpa [#allocation4], 1 }

</bundles_post_ra>
